<compile_context>
chip_gen: v6e
topology: v6e:2x2x1
jax: 0.10.0
libtpu: 0.0.40
codegen_flags: <defaults>
</compile_context>

<pallas_src>
import jax
import jax.numpy as jnp
from jax.experimental import pallas as pl
from jax.experimental.pallas import tpu as pltpu


def _conv1x1_kernel(w_ref, b_ref, x_ref, o_ref):
    # w_ref: SMEM (C_out, C_in), b_ref: SMEM (C_out,)
    # x_ref: VMEM (C_in, ts),    o_ref: VMEM (C_out, ts)
    c_out, c_in = w_ref.shape
    x = x_ref[...].astype(jnp.float32)              # (C_in, ts)
    rows = []
    for co in range(c_out):                         # fully unrolled (tiny channel counts)
        acc = w_ref[co, 0] * x[0:1, :]
        for ci in range(1, c_in):
            acc = acc + w_ref[co, ci] * x[ci:ci + 1, :]
        rows.append(acc + b_ref[co])
    o_ref[...] = jnp.concatenate(rows, axis=0).astype(o_ref.dtype)


def _pick_spatial_tile(S, target=8192):
    """Large lane-dense spatial tile: multiple of 128, or the full extent."""
    if S <= target:
        return S                    # full-extent block is always legal
    return (target // 128) * 128    # cdiv grid + Pallas masking handle the tail


def outconv_forward(x, weight, bias, *, ts=None):
    """1x1x1 Conv3d forward.

    x:      (N, C_in, D, H, W)
    weight: (C_out, C_in, 1, 1, 1)
    bias:   (C_out,)
    returns (N, C_out, D, H, W)
    """
    N, C_in, D, H, W = x.shape
    C_out = weight.shape[0]
    S = D * H * W

    x3d = x.reshape(N, C_in, S)          # free reshape, no data movement
    w2d = weight.reshape(C_out, C_in)
    b1d = bias.reshape(C_out)

    if ts is None:
        ts = _pick_spatial_tile(S)
    n_s = pl.cdiv(S, ts)

    out3d = pl.pallas_call(
        _conv1x1_kernel,
        out_shape=jax.ShapeDtypeStruct((N, C_out, S), x.dtype),
        grid=(N, n_s),
        in_specs=[
            pl.BlockSpec(memory_space=pltpu.MemorySpace.SMEM),          # weights
            pl.BlockSpec(memory_space=pltpu.MemorySpace.SMEM),          # bias
            pl.BlockSpec((None, C_in, ts), lambda n, s: (n, 0, s)),     # x tile
        ],
        out_specs=pl.BlockSpec((None, C_out, ts), lambda n, s: (n, 0, s)),
        compiler_params=pltpu.CompilerParams(
            dimension_semantics=("parallel", "parallel")),
    )(w2d, b1d, x3d)

    return out3d.reshape(N, C_out, D, H, W)


if __name__ == "__main__":
    # Small shapes consistent with Conv3d(in_ch=4, out_ch=3, kernel_size=1).
    N, C_in, C_out, D, H, W = 2, 4, 3, 4, 8, 16   # S = D*H*W = 512

    key = jax.random.PRNGKey(0)
    kx, kw, kb = jax.random.split(key, 3)

    x = jax.random.normal(kx, (N, C_in, D, H, W), dtype=jnp.float32)
    # Deterministic init mimicking Conv3d default (uniform in +-1/sqrt(fan_in)).
    fan_in = C_in * 1 * 1 * 1
    bound = 1.0 / jnp.sqrt(jnp.float32(fan_in))
    weight = jax.random.uniform(kw, (C_out, C_in, 1, 1, 1),
                                dtype=jnp.float32, minval=-bound, maxval=bound)
    bias = jax.random.uniform(kb, (C_out,), dtype=jnp.float32,
                              minval=-bound, maxval=bound)

    y = outconv_forward(x, weight, bias)
    jax.block_until_ready(y)

    # Reference check (plain JAX einsum over channels).
    y_ref = jnp.einsum("ncdhw,oc->nodhw", x, weight.reshape(C_out, C_in)) \
            + bias.reshape(1, C_out, 1, 1, 1)
    assert y.shape == (N, C_out, D, H, W)
    assert jnp.allclose(y, y_ref, atol=1e-5, rtol=1e-5)

    print("KERNEL_OK")
</pallas_src>

<mosaic_0001>
module attributes {stable_mosaic.version = 11 : i64} {
  func.func @_conv1x1_kernel(%arg0: i32, %arg1: i32, %arg2: memref<3x4xf32, #tpu.memory_space<smem>>, %arg3: memref<3xf32, #tpu.memory_space<smem>>, %arg4: memref<1x4x512xf32, #tpu.memory_space<vmem>>, %arg5: memref<1x3x512xf32, #tpu.memory_space<vmem>>) attributes {dimension_semantics = [#tpu.dimension_semantics<parallel>, #tpu.dimension_semantics<parallel>], iteration_bounds = array<i64: 2, 1>, scalar_prefetch = 0 : i64, scratch_operands = 0 : i64, tpu.core_type = #tpu.core_type<tc>, window_params = [{transform_indices = @transform_0, window_bounds = array<i64: 3, 4>}, {transform_indices = @transform_1, window_bounds = array<i64: 3>}, {transform_indices = @transform_2, window_bounds = array<i64: 1, 4, 512>}, {transform_indices = @transform_3, window_bounds = array<i64: 1, 3, 512>}]} {
    %c0 = arith.constant 0 : index
    %c0_0 = arith.constant 0 : index
    %c0_1 = arith.constant 0 : index
    %0 = vector.load %arg4[%c0, %c0_0, %c0_1] : memref<1x4x512xf32, #tpu.memory_space<vmem>>, vector<1x4x512xf32>
    %1 = vector.shape_cast %0 : vector<1x4x512xf32> to vector<4x512xf32>
    %c0_2 = arith.constant 0 : index
    %c0_3 = arith.constant 0 : index
    %2 = memref.load %arg2[%c0_2, %c0_3] : memref<3x4xf32, #tpu.memory_space<smem>>
    %3 = vector.extract_strided_slice %1 {offsets = [0, 0], sizes = [1, 512], strides = [1, 1]} : vector<4x512xf32> to vector<1x512xf32>
    %4 = vector.broadcast %2 : f32 to vector<1x512xf32>
    %5 = arith.mulf %4, %3 : vector<1x512xf32>
    %c0_4 = arith.constant 0 : index
    %c1 = arith.constant 1 : index
    %6 = memref.load %arg2[%c0_4, %c1] : memref<3x4xf32, #tpu.memory_space<smem>>
    %7 = vector.extract_strided_slice %1 {offsets = [1, 0], sizes = [1, 512], strides = [1, 1]} : vector<4x512xf32> to vector<1x512xf32>
    %8 = vector.broadcast %6 : f32 to vector<1x512xf32>
    %9 = arith.mulf %8, %7 : vector<1x512xf32>
    %10 = arith.addf %5, %9 : vector<1x512xf32>
    %c0_5 = arith.constant 0 : index
    %c2 = arith.constant 2 : index
    %11 = memref.load %arg2[%c0_5, %c2] : memref<3x4xf32, #tpu.memory_space<smem>>
    %12 = vector.extract_strided_slice %1 {offsets = [2, 0], sizes = [1, 512], strides = [1, 1]} : vector<4x512xf32> to vector<1x512xf32>
    %13 = vector.broadcast %11 : f32 to vector<1x512xf32>
    %14 = arith.mulf %13, %12 : vector<1x512xf32>
    %15 = arith.addf %10, %14 : vector<1x512xf32>
    %c0_6 = arith.constant 0 : index
    %c3 = arith.constant 3 : index
    %16 = memref.load %arg2[%c0_6, %c3] : memref<3x4xf32, #tpu.memory_space<smem>>
    %17 = vector.extract_strided_slice %1 {offsets = [3, 0], sizes = [1, 512], strides = [1, 1]} : vector<4x512xf32> to vector<1x512xf32>
    %18 = vector.broadcast %16 : f32 to vector<1x512xf32>
    %19 = arith.mulf %18, %17 : vector<1x512xf32>
    %20 = arith.addf %15, %19 : vector<1x512xf32>
    %c0_7 = arith.constant 0 : index
    %21 = memref.load %arg3[%c0_7] : memref<3xf32, #tpu.memory_space<smem>>
    %22 = vector.broadcast %21 : f32 to vector<1x512xf32>
    %23 = arith.addf %20, %22 : vector<1x512xf32>
    %c1_8 = arith.constant 1 : index
    %c0_9 = arith.constant 0 : index
    %24 = memref.load %arg2[%c1_8, %c0_9] : memref<3x4xf32, #tpu.memory_space<smem>>
    %25 = vector.extract_strided_slice %1 {offsets = [0, 0], sizes = [1, 512], strides = [1, 1]} : vector<4x512xf32> to vector<1x512xf32>
    %26 = vector.broadcast %24 : f32 to vector<1x512xf32>
    %27 = arith.mulf %26, %25 : vector<1x512xf32>
    %c1_10 = arith.constant 1 : index
    %c1_11 = arith.constant 1 : index
    %28 = memref.load %arg2[%c1_10, %c1_11] : memref<3x4xf32, #tpu.memory_space<smem>>
    %29 = vector.extract_strided_slice %1 {offsets = [1, 0], sizes = [1, 512], strides = [1, 1]} : vector<4x512xf32> to vector<1x512xf32>
    %30 = vector.broadcast %28 : f32 to vector<1x512xf32>
    %31 = arith.mulf %30, %29 : vector<1x512xf32>
    %32 = arith.addf %27, %31 : vector<1x512xf32>
    %c1_12 = arith.constant 1 : index
    %c2_13 = arith.constant 2 : index
    %33 = memref.load %arg2[%c1_12, %c2_13] : memref<3x4xf32, #tpu.memory_space<smem>>
    %34 = vector.extract_strided_slice %1 {offsets = [2, 0], sizes = [1, 512], strides = [1, 1]} : vector<4x512xf32> to vector<1x512xf32>
    %35 = vector.broadcast %33 : f32 to vector<1x512xf32>
    %36 = arith.mulf %35, %34 : vector<1x512xf32>
    %37 = arith.addf %32, %36 : vector<1x512xf32>
    %c1_14 = arith.constant 1 : index
    %c3_15 = arith.constant 3 : index
    %38 = memref.load %arg2[%c1_14, %c3_15] : memref<3x4xf32, #tpu.memory_space<smem>>
    %39 = vector.extract_strided_slice %1 {offsets = [3, 0], sizes = [1, 512], strides = [1, 1]} : vector<4x512xf32> to vector<1x512xf32>
    %40 = vector.broadcast %38 : f32 to vector<1x512xf32>
    %41 = arith.mulf %40, %39 : vector<1x512xf32>
    %42 = arith.addf %37, %41 : vector<1x512xf32>
    %c1_16 = arith.constant 1 : index
    %43 = memref.load %arg3[%c1_16] : memref<3xf32, #tpu.memory_space<smem>>
    %44 = vector.broadcast %43 : f32 to vector<1x512xf32>
    %45 = arith.addf %42, %44 : vector<1x512xf32>
    %c2_17 = arith.constant 2 : index
    %c0_18 = arith.constant 0 : index
    %46 = memref.load %arg2[%c2_17, %c0_18] : memref<3x4xf32, #tpu.memory_space<smem>>
    %47 = vector.extract_strided_slice %1 {offsets = [0, 0], sizes = [1, 512], strides = [1, 1]} : vector<4x512xf32> to vector<1x512xf32>
    %48 = vector.broadcast %46 : f32 to vector<1x512xf32>
    %49 = arith.mulf %48, %47 : vector<1x512xf32>
    %c2_19 = arith.constant 2 : index
    %c1_20 = arith.constant 1 : index
    %50 = memref.load %arg2[%c2_19, %c1_20] : memref<3x4xf32, #tpu.memory_space<smem>>
    %51 = vector.extract_strided_slice %1 {offsets = [1, 0], sizes = [1, 512], strides = [1, 1]} : vector<4x512xf32> to vector<1x512xf32>
    %52 = vector.broadcast %50 : f32 to vector<1x512xf32>
    %53 = arith.mulf %52, %51 : vector<1x512xf32>
    %54 = arith.addf %49, %53 : vector<1x512xf32>
    %c2_21 = arith.constant 2 : index
    %c2_22 = arith.constant 2 : index
    %55 = memref.load %arg2[%c2_21, %c2_22] : memref<3x4xf32, #tpu.memory_space<smem>>
    %56 = vector.extract_strided_slice %1 {offsets = [2, 0], sizes = [1, 512], strides = [1, 1]} : vector<4x512xf32> to vector<1x512xf32>
    %57 = vector.broadcast %55 : f32 to vector<1x512xf32>
    %58 = arith.mulf %57, %56 : vector<1x512xf32>
    %59 = arith.addf %54, %58 : vector<1x512xf32>
    %c2_23 = arith.constant 2 : index
    %c3_24 = arith.constant 3 : index
    %60 = memref.load %arg2[%c2_23, %c3_24] : memref<3x4xf32, #tpu.memory_space<smem>>
    %61 = vector.extract_strided_slice %1 {offsets = [3, 0], sizes = [1, 512], strides = [1, 1]} : vector<4x512xf32> to vector<1x512xf32>
    %62 = vector.broadcast %60 : f32 to vector<1x512xf32>
    %63 = arith.mulf %62, %61 : vector<1x512xf32>
    %64 = arith.addf %59, %63 : vector<1x512xf32>
    %c2_25 = arith.constant 2 : index
    %65 = memref.load %arg3[%c2_25] : memref<3xf32, #tpu.memory_space<smem>>
    %66 = vector.broadcast %65 : f32 to vector<1x512xf32>
    %67 = arith.addf %64, %66 : vector<1x512xf32>
    %68 = tpu.concatenate %23, %45, %67 in 0 : vector<1x512xf32>, vector<1x512xf32>, vector<1x512xf32> -> vector<3x512xf32>
    %c0_26 = arith.constant 0 : index
    %c0_27 = arith.constant 0 : index
    %c0_28 = arith.constant 0 : index
    %69 = vector.load %arg5[%c0_26, %c0_27, %c0_28] : memref<1x3x512xf32, #tpu.memory_space<vmem>>, vector<1x3x512xf32>
    %70 = vector.shape_cast %69 : vector<1x3x512xf32> to vector<3x512xf32>
    %71 = vector.shape_cast %68 : vector<3x512xf32> to vector<1x3x512xf32>
    tpu.vector_store %arg5[%c0_26, %c0_27, %c0_28], %71 {strides = array<i32>} : memref<1x3x512xf32, #tpu.memory_space<vmem>>, vector<1x3x512xf32>,
    return
  }
  func.func @transform_0(%arg0: i32, %arg1: i32) -> (i32, i32) {
    %c0_i32 = arith.constant 0 : i32
    %c0_i32_0 = arith.constant 0 : i32
    %c0_i32_1 = arith.constant 0 : i32
    return %c0_i32, %c0_i32_0 : i32, i32
  }
  func.func @transform_1(%arg0: i32, %arg1: i32) -> i32 {
    %c0_i32 = arith.constant 0 : i32
    %c0_i32_0 = arith.constant 0 : i32
    return %c0_i32 : i32
  }
  func.func @transform_2(%arg0: i32, %arg1: i32) -> (i32, i32, i32) {
    %c0_i32 = arith.constant 0 : i32
    %c0_i32_0 = arith.constant 0 : i32
    return %arg0, %c0_i32, %arg1 : i32, i32, i32
  }
  func.func @transform_3(%arg0: i32, %arg1: i32) -> (i32, i32, i32) {
    %c0_i32 = arith.constant 0 : i32
    %c0_i32_0 = arith.constant 0 : i32
    return %arg0, %c0_i32, %arg1 : i32, i32, i32
  }
}

</mosaic_0001>

<bundles_post_ra>
// kernel: tpu_custom_call.1
= control target key start
LH: loop header
LB: loop body
LE: loop exit
PB: predicated region body
PF: predicated region fallthrough
CT: control target
= control target key end

     0   :  { %8 = vsyncpa [#allocation4], 0  ;;  %s1080_s0 = inlined_call_operand.hbm [shape: f32[3,4], index: 0, kind: input, shape index: {}]   ;;  %s1081_s1 = inlined_call_operand.vmem [shape: f32[3], index: 1, kind: input, shape index: {}]   ;;  %s1082_s2 = inlined_call_operand.hbm [shape: f32[2,4,512], index: 2, kind: input, shape index: {}]   ;;  %s1083_s3 = inlined_call_operand.vmem [shape: f32[2,3,512], index: 3, kind: output, shape index: {}]  }
   0x1   :  { %9 = vsyncpa [#allocation5], 0 }
   0x2   :  { %10 = vsyncpa [#allocation3], 0 }
   0x3   :  { %12 = vsyncpa [#allocation3 + $0x1], 0  ;;  %s862_s12 = smov 0   ;;  %s864_s13 = smov 0  }
   0x4   :  { %s866_s14 = smov 0   ;;  %s868_s15 = smov 0  }
   0x5   :  { %s870_s16 = smov 0   ;;  %s872_s17 = smov 0  }
   0x6 LB: > { %s599_s18 = sadd.s32 4294967295, %s837_s17   ;;  %p94_p0 = scmp.ne.s32.totalorder %s821_s13, %s817_s12  ;;  %s837_s17 = sphi %s872_s17, %s18_s17   ;;  %s833_s16 = sphi %s870_s16, %s1094_s16   ;;  %s829_s15 = sphi %s868_s15, %s1093_s15   ;;  %s825_s14 = sphi %s866_s14, %s1092_s14   ;;  %s821_s13 = sphi %s864_s13, %s1091_s13   ;;  %s817_s12 = sphi %s862_s12, %s1090_s12  }
   0x7   : > { %p892_p1 = scmp.eq.s32.totalorder %s599_s18, 0  ;;  %p601_p2 = scmp.ge.s32.totalorder %s837_s17, 1 }
   0x8   : > { %p133_p3 = scmp.lt.s32.totalorder %s837_s17, 3  ;;  %s155_s24 = sshll.u32 %s1081_s1, 4  ;;  %s156_s24 = int_to_ptr.vmem [resolvable:$true] %s155_s24 }
   0x9   : > { %p900_p4 = por %p892_p1, %p94_p0  ;;  %s30_s26 = sadd.s32 1, %s833_s16 }
   0xa   : > { %p904_p5 = pnand %p601_p2, %p133_p3  ;;  %p920_p8 = scmp.ge.s32.totalorder %s30_s26, 2 }
   0xb   : > { %s839_s28 = smov [#allocation2]   ;;  %s736_s4 = scalar_lea.vmem %s156_s24, 16 }
   0xc   : > { %p659_p6 = pneg %p904_p5  ;;  %p737_p9 = scmp.ne.s32.totalorder %s156_s24, %s736_s4 }
   0xd   : > { %p744_p13 = scmp.lt.s32.totalorder %s156_s24, %s156_s24  ;;  %p745_p0 = scmp.lt.s32.totalorder %s736_s4, %s736_s4 }
   0xe   : > { %p915_p7 = pnand %p659_p6, %p892_p1 }
   0xf   : > { %p746_p2 = por %p745_p0, %p744_p13 }
  0x10   : > { %662 = dma.hbm_to_smem (!%p915_p7), %s1080_s0, 64, %s839_s28, [#allocation4]  }
  0x11   : > { %p738_p10 = pneg %p915_p7 }
  0x13   : > { %p739_p11 = pnand %p738_p10, %p737_p9 }
  0x15   : > { %p740_p12 = pneg %p739_p11 }
  0x17   : > { %p747_p3 = pnand %p746_p2, %p740_p12 }
  0x19   : > { %750 = shalt.err (!%p747_p3)
}
  0x1a   : > { %s840_s5 = smov [#allocation6]   ;;  %s1096_s26 = smov (%p920_p8, %s30_s26), 0 }
  0x1b   : > { %665 = dma.vmem_to_smem (!%p915_p7), %s156_s24, 16, %s840_s5, [#allocation5]  }
  0x1c   : > { %s81_s6 = sadd.s32 1, %s825_s14  ;;  %p88_p6 = scmp.ne.s32.totalorder %s825_s14, %s821_s13 }
  0x1d   : > { %s76_s7 = ssub.s32 %s833_s16, %s1096_s26  ;;  %p89_p9 = scmp.eq.s32.totalorder %s837_s17, 0 }
  0x1e   : > { %p79_p10 = scmp.eq.s32.totalorder %s76_s7, 0  ;;  %p672_p11 = scmp.lt.s32.totalorder %s837_s17, 2 }
  0x1f   : > { %p90_p12 = por %p89_p9, %p88_p6  ;;  %s166_s8 = sand.u32 1, %s825_s14  }
  0x20   : > { %s946_s9 = scalar_select %p79_p10, %s825_s14, %s81_s6  }
  0x21   : > { %s605_s10 = sshll.u32 %s166_s8, 4  ;;  %s647_s11 = sshll.u32 %s833_s16, 8 }
  0x22   : > { %s178_s22 = scalar_lea.hbm %s1082_s2, %s647_s11  ;;  %s170_s23 = scalar_lea.vmem [#allocation7], %s605_s10 }
  0x23   : > { %s180_s24 = sshll.u32 %s170_s23, 4  ;;  %p952_p7 = pnand %p672_p11, %p90_p12  ;;  %s181_s24 = int_to_ptr.vmem [resolvable:$true] %s180_s24 }
  0x24   : > { %s167_s27 = scalar_lea.sflag [#allocation3], %s166_s8  ;;  %s764_s28 = scalar_lea.vmem %s181_s24, 256 }
  0x25   : > { %p753_p8 = pneg %p952_p7  ;;  %p765_p13 = scmp.ne.s32.totalorder %s181_s24, %s764_s28 }
  0x26   : > { %s841_s29 = smov [#allocation7]  }
  0x27   : > { %p767_p0 = pnand %p765_p13, %p753_p8  ;;  %s769_s30 = sshll.u32 %s841_s29, 4  ;;  %s770_s30 = int_to_ptr.vmem [resolvable:$false] %s769_s30 }
  0x28   : > { %s771_s4 = scalar_lea.vmem %s770_s30, 512  ;;  %p772_p3 = scmp.lt.s32.totalorder %s181_s24, %s770_s30 }
  0x29   : > { %p768_p2 = pneg %p767_p0  ;;  %p773_p6 = scmp.lt.s32.totalorder %s771_s4, %s764_s28 }
  0x2b   : > { %p774_p9 = por %p773_p6, %p772_p3 }
  0x2d   : > { %p775_p10 = pnand %p774_p9, %p768_p2 }
  0x2f   : > { %778 = shalt.err (!%p775_p10)
}
  0x30   : > { %669 = dma.hbm_to_vmem [thread:$0]  (!%p952_p7), %s178_s22, 256, %s181_s24, %s167_s27  }
  0x31   : > { %189 = sbr.rel (%p904_p5) target bundleno = 102 (0x66), region = 32 }
  0x36   : > { %804 = dma.done.wait (%p892_p1), [#allocation4], 64  }
  0x37   : > { %806 = vsyncadd (%p892_p1), [#allocation4], 4294967232 }
  0x38   : > { %808 = dma.done.wait (%p892_p1), [#allocation5], 16  }
  0x39   : > { %810 = vsyncadd (%p892_p1), [#allocation5], 4294967280  ;;  %s199_s5 = sand.u32 1, %s821_s13  }
  0x3a   : > { %s611_s6 = sshll.u32 %s199_s5, 4  ;;  %s200_s7 = scalar_lea.sflag [#allocation3], %s199_s5 }
  0x3b   : > { %s203_s8 = scalar_lea.vmem [#allocation7], %s611_s6 }
  0x3c   : > { %812 = dma.done.wait (%p900_p4), %s200_s7, 256  }
  0x3d   : > { %814 = vsyncadd (%p900_p4), %s200_s7, 4294967040 }
  0x3e   : > { %208 = sfence }
  0x3f   : > { %s244_s21 = sld [smem:[#allocation2]]  ;;  %v396_v0 = vlaneseq  ;;  %v977_v1 = vld [vmem:[%s203_s8] sm:$0xff]  ;;  %v979_v2 = vld [vmem:[%s203_s8 + $0x8] sm:$0xff]  ;;  %p233_p1 = scmp.lt.s32.totalorder %s829_s15, 1  ;;  %vm460_vm0 = vcmask 1040384   ;;  %vm465_vm1 = vcmask 1041408  }
  0x40   : > { %s614_s10 = sld [smem:[#allocation2 + $0x1]] }
  0x41   : > { %s617_s11 = sld [smem:[#allocation2 + $0x2]]  ;;  %v397_v5 = vshrl.u32 %v396_v0, 7  ;;  %s1098_s15 = smov (!%p233_p1, %s829_s15), 1 }
  0x42   : > { %s975_s12 = sld [smem:[#allocation2 + $0x3]]  ;;  %s648_s4 = sshll.u32 %s1098_s15, 4 }
  0x43   : > { %s981_s19 = sld [smem:[#allocation6]]  ;;  %v1002_v16 = vsub.s32 0, %v397_v5  ;;  %v1004_v17 = vsub.s32 4, %v397_v5  ;;  %s240_s7 = scalar_lea.vmem %s1083_s3, %s648_s4 }
  0x44   : > { %s983_s18 = sld [smem:[#allocation2 + $0x80]] }
  0x45   : > { %v245_v3 = vstv %s244_s21  ;;  %s985_s20 = sld [smem:[#allocation2 + $0x81]] }
  0x46   : > { %v249_v4 = vstv %s614_s10  ;;  %v246_v6 = vmul.f32 %v245_v3, %v977_v1  ;;  %v247_v7 = vmul.f32 %v245_v3, %v979_v2  ;;  %s991_s22 = sld [smem:[#allocation2 + $0x82]] }
  0x47   : > { %v250_v8 = vmul.f32 %v249_v4, %v977_v1  ;;  %v251_v9 = vmul.f32 %v249_v4, %v979_v2  ;;  %v263_v10 = vstv %s617_s11  ;;  %s993_s23 = sld [smem:[#allocation2 + $0x83]] }
  0x48   : > { %v264_v13 = vmul.f32 %v263_v10, %v977_v1  ;;  %v265_v14 = vmul.f32 %v263_v10, %v979_v2  ;;  %s997_s24 = sld [smem:[#allocation6 + $0x1]]  ;;  %v277_v15 = vstv %s975_s12 }
  0x49   : > { %v615_v11 = vrot.slane %v250_v8, 9  ;;  %v616_v12 = vrot.slane %v251_v9, 9  ;;  %s1000_s25 = sld [smem:[#allocation2 + $0x100]]  ;;  %v278_v22 = vmul.f32 %v277_v15, %v977_v1  ;;  %v279_v23 = vmul.f32 %v277_v15, %v979_v2 }
  0x4a   : > { %v618_v20 = vrot.slane %v264_v13, 10  ;;  %v619_v21 = vrot.slane %v265_v14, 10  ;;  %s1006_s27 = sld [smem:[#allocation2 + $0x101]]  ;;  %v295_v24 = vstv %s983_s18  ;;  %v291_v34 = vstv %s981_s19 }
  0x4b   : > { %v260_v18 = vadd.f32 %v615_v11, %v246_v6  ;;  %v261_v19 = vadd.f32 %v616_v12, %v247_v7  ;;  %v299_v25 = vstv %s985_s20  ;;  %s1012_s28 = sld [smem:[#allocation2 + $0x102]]  ;;  %v296_v28 = vmul.f32 %v295_v24, %v977_v1 }
  0x4c   : > { %v297_v29 = vmul.f32 %v295_v24, %v979_v2  ;;  %s1016_s29 = sld [smem:[#allocation2 + $0x103]]  ;;  %v621_v30 = vrot.slane %v278_v22, 11  ;;  %v622_v31 = vrot.slane %v279_v23, 11  ;;  %v300_v32 = vmul.f32 %v299_v25, %v977_v1 }
  0x4d   : > { %v274_v26 = vadd.f32 %v618_v20, %v260_v18  ;;  %v275_v27 = vadd.f32 %v619_v21, %v261_v19  ;;  %v301_v33 = vmul.f32 %v299_v25, %v979_v2  ;;  %v313_v35 = vstv %s991_s22  ;;  %s1028_s30 = sld [smem:[#allocation6 + $0x2]] }
  0x4e   : > { %v327_v36 = vstv %s993_s23  ;;  %v341_v37 = vstv %s997_s24  ;;  %v625_v40 = vrot.slane %v300_v32, 9  ;;  %v314_v42 = vmul.f32 %v313_v35, %v977_v1 }
  0x4f   : > { %v288_v38 = vadd.f32 %v621_v30, %v274_v26  ;;  %v289_v39 = vadd.f32 %v622_v31, %v275_v27  ;;  %v626_v41 = vrot.slane %v301_v33, 9  ;;  %v315_v43 = vmul.f32 %v313_v35, %v979_v2 }
  0x50   : > { %v328_v44 = vmul.f32 %v327_v36, %v977_v1  ;;  %v329_v45 = vmul.f32 %v327_v36, %v979_v2  ;;  %v310_v48 = vadd.f32 %v625_v40, %v296_v28  ;;  %v628_v50 = vrot.slane %v314_v42, 10 }
  0x51   : > { %v292_v46 = vadd.f32 %v291_v34, %v288_v38  ;;  %v293_v47 = vadd.f32 %v291_v34, %v289_v39  ;;  %v311_v49 = vadd.f32 %v626_v41, %v297_v29  ;;  %v629_v51 = vrot.slane %v315_v43, 10 }
  0x52   : > { %v631_v52 = vrot.slane %v328_v44, 11  ;;  %v632_v53 = vrot.slane %v329_v45, 11  ;;  %v345_v54 = vstv %s1000_s25  ;;  %v349_v55 = vstv %s1006_s27 }
  0x53   : > { %v363_v56 = vstv %s1012_s28  ;;  %v377_v57 = vstv %s1016_s29  ;;  %v324_v58 = vadd.f32 %v628_v50, %v310_v48  ;;  %v325_v59 = vadd.f32 %v629_v51, %v311_v49 }
  0x54   : > { %v346_v60 = vmul.f32 %v345_v54, %v977_v1  ;;  %v347_v61 = vmul.f32 %v345_v54, %v979_v2  ;;  %v350_v62 = vmul.f32 %v349_v55, %v977_v1  ;;  %v351_v63 = vmul.f32 %v349_v55, %v979_v2 }
  0x55   : > { %v364_v0 = vmul.f32 %v363_v56, %v977_v1  ;;  %v365_v3 = vmul.f32 %v363_v56, %v979_v2  ;;  %v338_v4 = vadd.f32 %v631_v52, %v324_v58  ;;  %v339_v5 = vadd.f32 %v632_v53, %v325_v59 }
  0x56   : > { %v378_v6 = vmul.f32 %v377_v57, %v977_v1  ;;  %v379_v7 = vmul.f32 %v377_v57, %v979_v2  ;;  %v636_v8 = vrot.slane %v350_v62, 9  ;;  %v637_v9 = vrot.slane %v351_v63, 9 }
  0x57   : > { %v639_v10 = vrot.slane %v364_v0, 10  ;;  %v640_v11 = vrot.slane %v365_v3, 10  ;;  %v342_v12 = vadd.f32 %v341_v37, %v338_v4  ;;  %v343_v13 = vadd.f32 %v341_v37, %v339_v5 }
  0x58   : > { %v360_v14 = vadd.f32 %v636_v8, %v346_v60  ;;  %v361_v15 = vadd.f32 %v637_v9, %v347_v61  ;;  %v642_v18 = vrot.slane %v378_v6, 11  ;;  %v643_v19 = vrot.slane %v379_v7, 11 }
  0x59   : > { %v391_v20 = vstv %s1028_s30  ;;  %v399_v21 = vrot.slane %v292_v46, %v1002_v16  ;;  %v403_v1 = vrot.slane %v292_v46, %v1004_v17  ;;  %v407_v23 = vrot.slane %v293_v47, %v1002_v16 }
  0x5a   : > { %v374_v22 = vadd.f32 %v639_v10, %v360_v14  ;;  %v375_v2 = vadd.f32 %v640_v11, %v361_v15  ;;  %v411_v24 = vrot.slane %v293_v47, %v1004_v17  ;;  %v421_v25 = vrot.slane %v342_v12, %v1002_v16 }
  0x5b   : > { %v425_v26 = vrot.slane %v342_v12, %v1004_v17  ;;  %v429_v27 = vrot.slane %v343_v13, %v1002_v16  ;;  %v433_v28 = vrot.slane %v343_v13, %v1004_v17 }
  0x5c   : > { %v388_v29 = vadd.f32 %v642_v18, %v374_v22  ;;  %v389_v30 = vadd.f32 %v643_v19, %v375_v2  ;;  %v461_v33 = vsel %vm460_vm0, %v399_v21, %v421_v25 }
  0x5d   : > { %v462_v34 = vsel %vm460_vm0, %v403_v1, %v425_v26  ;;  %v463_v35 = vsel %vm460_vm0, %v407_v23, %v429_v27  ;;  %v464_v36 = vsel %vm460_vm0, %v411_v24, %v433_v28 }
  0x5e   : > { %v392_v31 = vadd.f32 %v391_v20, %v388_v29  ;;  %v393_v32 = vadd.f32 %v391_v20, %v389_v30 }
  0x60   : > { %v443_v37 = vrot.slane %v392_v31, %v1002_v16  ;;  %v447_v38 = vrot.slane %v392_v31, %v1004_v17  ;;  %v451_v39 = vrot.slane %v393_v32, %v1002_v16  ;;  %v455_v40 = vrot.slane %v393_v32, %v1004_v17 }
  0x62   : > { %v466_v41 = vsel %vm465_vm1, %v461_v33, %v443_v37  ;;  %v467_v42 = vsel %vm465_vm1, %v462_v34, %v447_v38  ;;  %v468_v43 = vsel %vm465_vm1, %v463_v35, %v451_v39  ;;  %v469_v44 = vsel %vm465_vm1, %v464_v36, %v455_v40 }
  0x63   : > { %v474_v45 = vcombine.low %v466_v41, %v467_v42  ;;  %v475_v46 = vcombine.low %v468_v43, %v469_v44 }
  0x65   : > { %478 = vst [vmem:[%s240_s7] sm:$0x77] %v474_v45  ;;  %479 = vst [vmem:[%s240_s7 + $0x8] sm:$0x77] %v475_v46 }
  0x66 PF: > { %s18_s17 = sadd.s32 1, %s837_s17   ;;  %s1090_s12 = smov %s821_s13 }
  0x67   : > { %p15_p4 = scmp.ge.s32.totalorder %s18_s17, 4   ;;  %s1091_s13 = smov %s825_s14 }
  0x68   : > { %s1092_s14 = smov %s946_s9  ;;  %s1093_s15 = smov %s833_s16 }
  0x69   : > { %s1094_s16 = smov %s1096_s26  ;;  %17 = sbr.rel (!%p15_p4) target bundleno = 6 (0x6), region = 82 }
  0x6e   :  { %510 = vsyncpa [#allocation3], 1 }
  0x6f   :  { %512 = vsyncpa [#allocation3 + $0x1], 1 }
  0x70   :  { %513 = vsyncpa [#allocation4], 1 }
  0x71   :  { %515 = vsyncpa [#allocation4 + $0x1], 1 }
  0x72   :  { %516 = vsyncpa [#allocation5], 1 }
  0x73   :  { %518 = vsyncpa [#allocation5 + $0x1], 1 }

</bundles_post_ra>
